<compile_context>
chip_gen: v7x
topology: tpu7x:2x2x1
jax: 0.10.0
libtpu: 0.0.40
codegen_flags: <defaults>
</compile_context>

<pallas_src>
import jax
import jax.numpy as jnp
from jax.experimental import pallas as pl
from jax.experimental.pallas import tpu as pltpu

_LANE_TILE = 512            # lane-dense column width (multiple of 128)
_MAX_ROWS_PER_BLOCK = 2048  # 2048 * 512 * 4B = 4 MiB per input block (f32)


def _nloss_partial_kernel(pred_ref, eps2_ref, out_ref):
    """Per-block partial sums: out[0, :] = sum over rows of the elementwise loss."""
    pv = pred_ref[...].astype(jnp.float32)
    e2 = eps2_ref[...].astype(jnp.float32)
    # 0.5*log(pv) + e2/(2*pv)  ==  0.5 * (log(pv) + e2 * (1/pv))
    loss = 0.5 * (jnp.log(pv) + e2 * pl.reciprocal(pv))
    # Reduce only the sublane (row) axis per block; the cheap cross-lane reduce
    # over the small (num_blocks, 512) partials happens once in the wrapper.
    out_ref[...] = jnp.sum(loss, axis=0, keepdims=True)


def corrected_n_loss(pred_var: jax.Array, target_eps_squared: jax.Array) -> jax.Array:
    """Pallas implementation of CorrectedNLoss.forward (returns a scalar mean)."""
    assert pred_var.shape == target_eps_squared.shape
    n = pred_var.size

    # ---- choose a lane-dense 2-D layout and row tile ----
    cols = _LANE_TILE if n >= _LANE_TILE else 128
    rows = -(-n // cols)                        # ceil(n / cols)
    tm = min(rows, _MAX_ROWS_PER_BLOCK)         # block rows (full-extent if small)
    rows_padded = -(-rows // tm) * tm           # make tm divide rows exactly
    padded_n = rows_padded * cols
    pad = padded_n - n

    pv_flat = pred_var.reshape(-1)
    e2_flat = target_eps_squared.reshape(-1)
    if pad:
        # Neutral padding: log(1) = 0 and 0 * (1/1) = 0 -> contributes nothing.
        pv_flat = jnp.pad(pv_flat, (0, pad), constant_values=1)
        e2_flat = jnp.pad(e2_flat, (0, pad), constant_values=0)

    pv2 = pv_flat.reshape(rows_padded, cols)
    e22 = e2_flat.reshape(rows_padded, cols)
    num_blocks = rows_padded // tm

    partials = pl.pallas_call(
        _nloss_partial_kernel,
        out_shape=jax.ShapeDtypeStruct((num_blocks, cols), jnp.float32),
        grid_spec=pltpu.PrefetchScalarGridSpec(
            num_scalar_prefetch=0,
            grid=(num_blocks,),
            in_specs=[
                pl.BlockSpec((tm, cols), lambda i: (i, 0)),
                pl.BlockSpec((tm, cols), lambda i: (i, 0)),
            ],
            out_specs=pl.BlockSpec((1, cols), lambda i: (i, 0)),
        ),
        compiler_params=pltpu.CompilerParams(
            # Each step writes an independent output block -> fully parallel
            # (lets both v7x TensorCores stream HBM; neutral on v5e/v6e).
            dimension_semantics=("parallel",),
            # Large blocks: raise the scoped VMEM limit (v5e default is 16 MiB)
            # while staying well under v7x's 64 MiB physical VMEM.
            vmem_limit_bytes=48 * 1024 * 1024,
        ),
    )(pv2, e22)

    return jnp.sum(partials) / jnp.float32(n)


def _reference(pred_var, target_eps_squared):
    loss = 0.5 * jnp.log(pred_var) + target_eps_squared / (2.0 * pred_var)
    return jnp.mean(loss)


if __name__ == "__main__":
    key = jax.random.PRNGKey(0)
    k1, k2 = jax.random.split(key)

    # Small GARCH-like shapes: batch=16 sequences of length 128.
    B, T = 16, 128
    # pred_var must be positive (it's a predicted variance).
    pred_var = jax.random.uniform(k1, (B, T), jnp.float32, minval=0.1, maxval=2.0)
    eps = jax.random.normal(k2, (B, T), jnp.float32)
    target_eps_squared = eps * eps

    out = corrected_n_loss(pred_var, target_eps_squared)
    out = jax.block_until_ready(out)

    ref = _reference(pred_var, target_eps_squared)
    assert out.shape == () and out.dtype == jnp.float32
    assert jnp.allclose(out, ref, rtol=1e-5, atol=1e-5), (out, ref)

    print("KERNEL_OK")
</pallas_src>

<mosaic_0001>
module attributes {stable_mosaic.version = 11 : i64} {
  func.func @_nloss_partial_kernel(%arg0: i32, %arg1: memref<4x512xf32, #tpu.memory_space<vmem>>, %arg2: memref<4x512xf32, #tpu.memory_space<vmem>>, %arg3: memref<1x512xf32, #tpu.memory_space<vmem>>) attributes {dimension_semantics = [#tpu.dimension_semantics<parallel>], iteration_bounds = array<i64: 1>, scalar_prefetch = 0 : i64, scratch_operands = 0 : i64, tpu.core_type = #tpu.core_type<tc>, window_params = [{transform_indices = @transform_0, window_bounds = array<i64: 4, 512>}, {transform_indices = @transform_1, window_bounds = array<i64: 4, 512>}, {transform_indices = @transform_2, window_bounds = array<i64: 1, 512>}]} {
    %c0 = arith.constant 0 : index
    %c0_0 = arith.constant 0 : index
    %0 = vector.load %arg1[%c0, %c0_0] : memref<4x512xf32, #tpu.memory_space<vmem>>, vector<4x512xf32>
    %c0_1 = arith.constant 0 : index
    %c0_2 = arith.constant 0 : index
    %1 = vector.load %arg2[%c0_1, %c0_2] : memref<4x512xf32, #tpu.memory_space<vmem>>, vector<4x512xf32>
    %2 = math.log %0 : vector<4x512xf32>
    %3 = tpu.reciprocal %0 : vector<4x512xf32> -> vector<4x512xf32>
    %4 = arith.mulf %1, %3 : vector<4x512xf32>
    %5 = arith.addf %2, %4 : vector<4x512xf32>
    %cst = arith.constant 5.000000e-01 : f32
    %6 = vector.broadcast %cst : f32 to vector<4x512xf32>
    %7 = arith.mulf %6, %5 : vector<4x512xf32>
    %cst_3 = arith.constant dense<0.000000e+00> : vector<512xf32>
    %8 = vector.multi_reduction <add>, %7, %cst_3 [0] : vector<4x512xf32> to vector<512xf32>
    %9 = vector.shape_cast %8 : vector<512xf32> to vector<1x512xf32>
    %c0_4 = arith.constant 0 : index
    %c0_5 = arith.constant 0 : index
    %10 = vector.load %arg3[%c0_4, %c0_5] : memref<1x512xf32, #tpu.memory_space<vmem>>, vector<1x512xf32>
    tpu.vector_store %arg3[%c0_4, %c0_5], %9 {strides = array<i32>} : memref<1x512xf32, #tpu.memory_space<vmem>>, vector<1x512xf32>,
    return
  }
  func.func @transform_0(%arg0: i32) -> (i32, i32) {
    %c0_i32 = arith.constant 0 : i32
    %c0_i32_0 = arith.constant 0 : i32
    return %arg0, %c0_i32 : i32, i32
  }
  func.func @transform_1(%arg0: i32) -> (i32, i32) {
    %c0_i32 = arith.constant 0 : i32
    %c0_i32_0 = arith.constant 0 : i32
    return %arg0, %c0_i32 : i32, i32
  }
  func.func @transform_2(%arg0: i32) -> (i32, i32) {
    %c0_i32 = arith.constant 0 : i32
    %c0_i32_0 = arith.constant 0 : i32
    return %arg0, %c0_i32 : i32, i32
  }
}

</mosaic_0001>

<bundles_post_ra>
// kernel: tpu_custom_call.1
= control target key start
LH: loop header
LB: loop body
LE: loop exit
PB: predicated region body
PF: predicated region fallthrough
CT: control target
= control target key end

     0   :  { %7 = vsyncpa [#allocation3], 0  ;;  %s276_s0 = inlined_call_operand.hbm [shape: f32[4,512], index: 0, kind: input, shape index: {}]   ;;  %s277_s1 = inlined_call_operand.hbm [shape: f32[4,512], index: 1, kind: input, shape index: {}]   ;;  %s278_s2 = inlined_call_operand.hbm [shape: f32[1,512], index: 2, kind: output, shape index: {}]  }
   0x1   :  { %8 = vsyncpa [#allocation6], 0 }
   0x2   :  { %9 = vsyncpa [#allocation4], 0  ;;  %s221_s9 = smov [#allocation2]   ;;  %s222_s11 = smov [#allocation5]  }
   0x3   :  { %s16_s10 = sshll.u32 %s221_s9, 4  ;;  %s26_s12 = sshll.u32 %s222_s11, 4  ;;  %s17_s10 = int_to_ptr.vmem [resolvable:$true] %s16_s10  ;;  %s27_s12 = int_to_ptr.vmem [resolvable:$true] %s26_s12 }
   0x4   :  { %s149_s15 = scalar_lea.hbm %s276_s0, 256 }
   0x5   :  { %p150_p0 = scmp.ne.s32.totalorder %s276_s0, %s149_s15  ;;  %p153_p1 = scmp.lt.u32.totalorder %s149_s15, %s276_s0 }
   0x7   :  { %p155_p2 = pnand %p153_p1, %p150_p0 }
   0x9   :  { %158 = shalt.err (!%p155_p2)
}
   0xa   :  { %s159_s20 = scalar_lea.vmem %s17_s10, 256  ;;  %p164_p4 = scmp.lt.s32.totalorder %s17_s10, %s17_s10 }
   0xb   :  { %p160_p3 = scmp.ne.s32.totalorder %s17_s10, %s159_s20  ;;  %p165_p5 = scmp.lt.s32.totalorder %s159_s20, %s159_s20 }
   0xd   :  { %p166_p6 = por %p165_p5, %p164_p4 }
   0xf   :  { %p167_p7 = pnand %p166_p6, %p160_p3 }
  0x11   :  { %170 = shalt.err (!%p167_p7)
}
  0x12   :  { %19 = dma.hbm_to_vmem [thread:$0]  %s276_s0, 256, %s17_s10, [#allocation3]  }
  0x13   :  { %s171_s25 = scalar_lea.hbm %s277_s1, 256 }
  0x14   :  { %p172_p8 = scmp.ne.s32.totalorder %s277_s1, %s171_s25  ;;  %p175_p9 = scmp.lt.u32.totalorder %s171_s25, %s277_s1 }
  0x16   :  { %p177_p10 = pnand %p175_p9, %p172_p8 }
  0x18   :  { %180 = shalt.err (!%p177_p10)
}
  0x19   :  { %s181_s30 = scalar_lea.vmem %s27_s12, 256  ;;  %p186_p12 = scmp.lt.s32.totalorder %s27_s12, %s27_s12 }
  0x1a   :  { %p182_p11 = scmp.ne.s32.totalorder %s27_s12, %s181_s30  ;;  %p187_p13 = scmp.lt.s32.totalorder %s181_s30, %s181_s30 }
  0x1c   :  { %p188_p0 = por %p187_p13, %p186_p12 }
  0x1e   :  { %p189_p1 = pnand %p188_p0, %p182_p11 }
  0x20   :  { %192 = shalt.err (!%p189_p1)
}
  0x21   :  { %29 = dma.hbm_to_vmem [thread:$0]  %s277_s1, 256, %s27_s12, [#allocation6]  }
  0x22   :  { %215 = dma.done.wait [#allocation3], 256  }
  0x23   :  { %216 = vsyncadd [#allocation3], 4294967040 }
  0x24   :  { %217 = dma.done.wait [#allocation6], 256  }
  0x25   :  { %218 = vsyncadd [#allocation6], 4294967040  ;;  %v36_v0 = vld [vmem:[#allocation2] sm:$0xff]  ;;  %v37_v1 = vld [vmem:[#allocation2 + $0x8] sm:$0xff]  ;;  %vm58_vm0 = vcmask 1043456   ;;  %v96_v32 = vlaneseq  ;;  %s224_s1 = smov [#allocation7]  }
  0x26   :  { %141 = vlog2.f32 %v36_v0  ;;  %v38_v3 = vld [vmem:[#allocation5] sm:$0xff]  ;;  %v39_v5 = vld [vmem:[#allocation5 + $0x8] sm:$0xff]  ;;  %v223_v30 = vmov 1966171168   ;;  %s127_s4 = sshll.u32 %s224_s1, 4  ;;  %s128_s4 = int_to_ptr.vmem [resolvable:$true] %s127_s4 }
  0x27   :  { %143 = vlog2.f32 %v37_v1  ;;  %v94_v31 = vunpack.c.l.s4 %v223_v30  ;;  %v97_v42 = vshrl.u32 %v96_v32, 7  ;;  %vm118_vm1 = vcmp.lt.s32.totalorder %v96_v32, 512  ;;  %s193_s5 = scalar_lea.vmem %s128_s4, 64  ;;  %p198_p3 = scmp.lt.s32.totalorder %s128_s4, %s128_s4 }
  0x28   :  { %145 = vrcp.f32 %v36_v0  ;;  %p194_p2 = scmp.ne.s32.totalorder %s128_s4, %s193_s5  ;;  %p199_p4 = scmp.lt.s32.totalorder %s193_s5, %s193_s5 }
  0x29   :  { %147 = vrcp.f32 %v37_v1  ;;  %v95_v41 = vunpack.c.0.s8 %v94_v31 }
  0x2a   :  { %p200_p5 = por %p199_p4, %p198_p3 }
  0x2b   :  { %v98_v50 = vsub.s32 %v95_v41, %v97_v42 }
  0x2c   :  { %p201_p6 = pnand %p200_p5, %p194_p2 }
  0x30   :  { %v142_v2 = vpop.eup %141 }
  0x31   :  { %v144_v4 = vpop.eup %143  ;;  %v41_v6 = vmul.f32 0.6931472, %v142_v2 }
  0x32   :  { %v146_v7 = vpop.eup %145  ;;  %v43_v8 = vmul.f32 0.6931472, %v144_v4 }
  0x33   :  { %v148_v9 = vpop.eup %147  ;;  %v46_v10 = vmul.f32 %v146_v7, %v38_v3 }
  0x34   :  { %v47_v11 = vmul.f32 %v148_v9, %v39_v5 }
  0x35   :  { %v48_v12 = vadd.f32 %v46_v10, %v41_v6 }
  0x36   :  { %v49_v13 = vadd.f32 %v47_v11, %v43_v8 }
  0x37   :  { %v50_v14 = vmul.f32 0.5, %v48_v12 }
  0x38   :  { %v51_v15 = vmul.f32 0.5, %v49_v13 }
  0x39   :  { %v54_v16 = vcombine.high %v50_v14, %v50_v14  ;;  %v59_v17 = vsel %vm58_vm0, %v50_v14, 0.0 }
  0x3a   :  { %v55_v18 = vcombine.high %v51_v15, %v51_v15  ;;  %v60_v19 = vrot.slane %v59_v17, 4  ;;  %v73_v20 = vsel %vm58_vm0, %v51_v15, 0.0 }
  0x3b   :  { %v66_v21 = vsel %vm58_vm0, %v54_v16, 0.0  ;;  %v74_v22 = vrot.slane %v73_v20, 4 }
  0x3c   :  { %v61_v23 = vadd.f32 %v60_v19, %v59_v17  ;;  %v67_v24 = vrot.slane %v66_v21, 4  ;;  %v80_v25 = vsel %vm58_vm0, %v55_v18, 0.0 }
  0x3d   :  { %v75_v26 = vadd.f32 %v74_v22, %v73_v20  ;;  %v81_v27 = vrot.slane %v80_v25, 4 }
  0x3e   :  { %v62_v28 = vrot.slane %v61_v23, 2  ;;  %v68_v29 = vadd.f32 %v67_v24, %v66_v21 }
  0x3f   :  { %v76_v33 = vrot.slane %v75_v26, 2  ;;  %v82_v34 = vadd.f32 %v81_v27, %v80_v25 }
  0x40   :  { %v63_v35 = vadd.f32 %v62_v28, %v61_v23  ;;  %v69_v36 = vrot.slane %v68_v29, 2 }
  0x41   :  { %v77_v37 = vadd.f32 %v76_v33, %v75_v26  ;;  %v83_v38 = vrot.slane %v82_v34, 2 }
  0x42   :  { %v64_v39 = vrot.slane %v63_v35, 1  ;;  %v70_v40 = vadd.f32 %v69_v36, %v68_v29 }
  0x43   :  { %v78_v43 = vrot.slane %v77_v37, 1  ;;  %v84_v44 = vadd.f32 %v83_v38, %v82_v34 }
  0x44   :  { %v65_v45 = vadd.f32 %v64_v39, %v63_v35  ;;  %v71_v46 = vrot.slane %v70_v40, 1 }
  0x45   :  { %v79_v47 = vadd.f32 %v78_v43, %v77_v37  ;;  %v85_v48 = vrot.slane %v84_v44, 1 }
  0x46   :  { %v72_v49 = vadd.f32 %v71_v46, %v70_v40 }
  0x47   :  { %v86_v51 = vadd.f32 %v85_v48, %v84_v44 }
  0x48   :  { %v91_v52 = vcombine.low %v65_v45, %v72_v49 }
  0x49   :  { %v92_v53 = vcombine.low %v79_v47, %v86_v51 }
  0x4a   :  { %v99_v54 = vrot.slane %v91_v52, %v98_v50 }
  0x4b   :  { %v106_v55 = vrot.slane %v92_v53, %v98_v50 }
  0x4d   :  { %v107_v56 = vcombine.low %v99_v54, %v106_v55 }
  0x4f   :  { %v114_v57 = vrot.slane %v107_v56, %v98_v50 }
  0x51   :  { %120 = vst.msk [vmem:[#allocation7] sm:$0xf] %vm118_vm1, %v114_v57 }
  0x52   :  { %204 = shalt.err (!%p201_p6)
}
  0x53   :  { %s205_s8 = scalar_lea.hbm %s278_s2, 64 }
  0x54   :  { %p206_p7 = scmp.ne.s32.totalorder %s278_s2, %s205_s8  ;;  %p209_p8 = scmp.lt.u32.totalorder %s205_s8, %s278_s2 }
  0x56   :  { %p211_p9 = pnand %p209_p8, %p206_p7 }
  0x58   :  { %214 = shalt.err (!%p211_p9)
}
  0x59   :  { %130 = dma.vmem_to_hbm [thread:$0]  %s128_s4, 64, %s278_s2, [#allocation4]  }
  0x5a   :  { %219 = dma.done.wait [#allocation4], 64  }
  0x5b   :  { %220 = vsyncadd [#allocation4], 4294967232 }
  0x5c   :  { %134 = vsyncpa [#allocation3], 1 }
  0x5d   :  { %135 = vsyncpa [#allocation6], 1 }
  0x5e   :  { %136 = vsyncpa [#allocation4], 1 }

</bundles_post_ra>
